<compile_context>
chip_gen: v5e
topology: v5e:2x2
jax: 0.10.0
libtpu: 0.0.40
codegen_flags: <defaults>
</compile_context>

<pallas_src>
import functools

import jax
import jax.numpy as jnp
from jax import lax
from jax.experimental import pallas as pl
from jax.experimental.pallas import tpu as pltpu


def period_kernel(x_ref, w_ref, b_ref, o_ref, *, width, group):
    # x_ref: (C_in, tp)       pixels on the 128-lane axis (batch dim squeezed)
    # w_ref: (3*group, C_in)  folded conv1+conv2 weights, each group zero-padded
    # b_ref: (3*group, 1)     folded bias, padded the same way
    # o_ref: (group, tp)      full padded-channel slab -> unmasked dense stores
    x = x_ref[...]
    tp = x.shape[-1]

    # single folded 1x1-conv matmul on the MXU: (3G, C_in) @ (C_in, tp) + b
    k = jnp.dot(w_ref[...], x, preferred_element_type=jnp.float32) + b_ref[...]

    # positional indices generated in-kernel (no gx/gy HBM traffic):
    # flattened pixel index p = h*W + w  ->  gx = p % W, gy = p // W
    p0 = pl.program_id(1) * tp
    idx = p0 + lax.broadcasted_iota(jnp.int32, (1, tp), 1)
    if width > 0 and (width & (width - 1)) == 0:
        # power-of-two W: strength-reduced to cheap VALU bit ops
        shift = width.bit_length() - 1
        gx = (idx & (width - 1)).astype(jnp.float32)
        gy = (idx >> shift).astype(jnp.float32)
    else:
        # TODO(synk): non-pow2 W keeps int div/mod; a float-recip+floor path
        # with an off-by-one fixup is possible if this ever shows up in bundles.
        gx = (idx % width).astype(jnp.float32)
        gy = (idx // width).astype(jnp.float32)

    xk = k[0 * group:1 * group]                    # sublane-aligned group slices
    yk = k[1 * group:2 * group]
    bk = k[2 * group:3 * group]
    # store the full padded slab: unmasked, lane- and sublane-dense vst
    o_ref[...] = jnp.sin(xk * gx + yk * gy + bk)


def period_forward(noise_nchw, w1, b1, w2, b2, out_ch, *, tile_p=16384):
    """noise_nchw: (N, C_in, H, W) float32 -> (N, out_ch, H, W).

    Weights are stored already transposed (in, out):
      w1: (C_in, hidden), b1: (hidden,), w2: (hidden, 3*out_ch), b2: (3*out_ch,)
    """
    N, C_in, H, W = noise_nchw.shape
    P = H * W

    # ---- fold conv1 @ conv2 (exact: no nonlinearity between them) ----
    w_eff = w1 @ w2                                # (C_in, 3*out_ch)
    b_eff = b1 @ w2 + b2                           # (3*out_ch,)

    # pad each of the 3 output groups to a sublane-aligned width (multiple of 8)
    group = ((out_ch + 7) // 8) * 8
    w_g = jnp.pad(w_eff.reshape(C_in, 3, out_ch),
                  ((0, 0), (0, 0), (0, group - out_ch)))
    w_pad = jnp.transpose(w_g, (1, 2, 0)).reshape(3 * group, C_in)   # (3G, C_in)
    b_g = jnp.pad(b_eff.reshape(3, out_ch), ((0, 0), (0, group - out_ch)))
    b_pad = b_g.reshape(3 * group, 1)                                # (3G, 1)

    # ---- pixel-on-lane layout: free reshape NCHW -> (N, C_in, H*W) ----
    x3 = noise_nchw.reshape(N, C_in, P)

    # ---- tile choice: big lane-dense pixel tiles, >= 2 total grid steps ----
    if P <= 128:
        tp = P                                     # last dim == full extent
    else:
        tp = max(128, (min(tile_p, P) // 128) * 128)
        # v7x megacore: if the whole batch would be one grid step, split pixels
        if N == 1 and pl.cdiv(P, tp) < 2:
            tp = max(128, (((P + 1) // 2 + 127) // 128) * 128)
    n_pt = pl.cdiv(P, tp)
    grid = (N, n_pt)

    kernel = functools.partial(period_kernel, width=W, group=group)

    out3 = pl.pallas_call(
        kernel,
        out_shape=jax.ShapeDtypeStruct((N, group, P), jnp.float32),
        grid_spec=pltpu.PrefetchScalarGridSpec(
            num_scalar_prefetch=0,
            grid=grid,
            in_specs=[
                pl.BlockSpec((pl.Squeezed(), C_in, tp),
                             lambda n, p: (n, 0, p)),                 # x slab
                pl.BlockSpec((3 * group, C_in), lambda n, p: (0, 0)), # folded W
                pl.BlockSpec((3 * group, 1), lambda n, p: (0, 0)),    # folded b
            ],
            out_specs=pl.BlockSpec((pl.Squeezed(), group, tp),
                                   lambda n, p: (n, 0, p)),
        ),
        compiler_params=pltpu.CompilerParams(
            dimension_semantics=("parallel", "parallel"),
            vmem_limit_bytes=32 * 1024 * 1024),
    )(x3, w_pad, b_pad)

    # one channel slice in the wrapper (fused with the free reshape);
    # disappears entirely when out_ch is already a multiple of 8
    if group != out_ch:
        out3 = out3[:, :out_ch, :]
    return out3.reshape(N, out_ch, H, W)


def period_reference(noise_nchw, w1, b1, w2, b2, out_ch):
    """Pure-JAX reference mirroring the PyTorch forward (two separate 1x1 convs)."""
    N, C_in, H, W = noise_nchw.shape
    x_rows = jnp.transpose(noise_nchw, (0, 2, 3, 1)).reshape(-1, C_in)
    h = x_rows @ w1 + b1[None, :]
    k = h @ w2 + b2[None, :]
    k = jnp.transpose(k.reshape(N, H, W, 3 * out_ch), (0, 3, 1, 2))  # NCHW
    xk = k[:, 0 * out_ch:1 * out_ch]
    yk = k[:, 1 * out_ch:2 * out_ch]
    bk = k[:, 2 * out_ch:3 * out_ch]
    gx = jnp.arange(W, dtype=jnp.float32)[None, None, None, :]
    gy = jnp.arange(H, dtype=jnp.float32)[None, None, :, None]
    return jnp.sin(xk * gx + yk * gy + bk)


if __name__ == "__main__":
    # Period(input=5, output=7), hidden=32 (fixed in __init__)
    C_IN, OUT, HIDDEN = 5, 7, 32
    N, H, W = 2, 16, 16      # 256 pixels/image -> grid (2, 1): one big tile per image

    key = jax.random.PRNGKey(0)
    k1, k2, k3, k4, k5 = jax.random.split(key, 5)

    # deterministic synthetic parameters; stored already transposed: (in, out)
    w1 = jax.random.normal(k1, (C_IN, HIDDEN), dtype=jnp.float32) * 0.2
    b1 = jax.random.normal(k2, (HIDDEN,), dtype=jnp.float32) * 0.05
    w2 = jax.random.normal(k3, (HIDDEN, 3 * OUT), dtype=jnp.float32) * 0.1
    b2 = jax.random.normal(k4, (3 * OUT,), dtype=jnp.float32) * 0.05

    noise = jax.random.normal(k5, (N, C_IN, H, W), dtype=jnp.float32)

    out = period_forward(noise, w1, b1, w2, b2, OUT)
    out = jax.block_until_ready(out)

    ref = period_reference(noise, w1, b1, w2, b2, OUT)
    assert out.shape == (N, OUT, H, W), out.shape
    err = float(jnp.max(jnp.abs(out - ref)))
    # folding w1@w2 is algebraically exact; tolerance covers f32 summation reorder
    assert err < 1e-4, f"mismatch vs reference: max abs err {err}"

    print("KERNEL_OK")
</pallas_src>

<mosaic_0001>
module attributes {stable_mosaic.version = 11 : i64} {
  func.func @period_kernel(%arg0: i32, %arg1: i32, %arg2: memref<1x5x256xf32, #tpu.memory_space<vmem>>, %arg3: memref<24x5xf32, #tpu.memory_space<vmem>>, %arg4: memref<24x1xf32, #tpu.memory_space<vmem>>, %arg5: memref<1x8x256xf32, #tpu.memory_space<vmem>>) attributes {dimension_semantics = [#tpu.dimension_semantics<parallel>, #tpu.dimension_semantics<parallel>], iteration_bounds = array<i64: 2, 1>, scalar_prefetch = 0 : i64, scratch_operands = 0 : i64, tpu.core_type = #tpu.core_type<tc>, window_params = [{transform_indices = @transform_0, window_bounds = array<i64: 1, 5, 256>}, {pipeline_mode = #tpu.pipeline_mode<synchronous>, transform_indices = @transform_1, window_bounds = array<i64: 24, 5>}, {pipeline_mode = #tpu.pipeline_mode<synchronous>, transform_indices = @transform_2, window_bounds = array<i64: 24, 1>}, {transform_indices = @transform_3, window_bounds = array<i64: 1, 8, 256>}]} {
    %c0 = arith.constant 0 : index
    %c0_0 = arith.constant 0 : index
    %c0_1 = arith.constant 0 : index
    %0 = vector.load %arg2[%c0, %c0_0, %c0_1] : memref<1x5x256xf32, #tpu.memory_space<vmem>>, vector<1x5x256xf32>
    %1 = vector.shape_cast %0 : vector<1x5x256xf32> to vector<5x256xf32>
    %c0_2 = arith.constant 0 : index
    %c0_3 = arith.constant 0 : index
    %2 = vector.load %arg3[%c0_2, %c0_3] : memref<24x5xf32, #tpu.memory_space<vmem>>, vector<24x5xf32>
    %cst = arith.constant dense<0.000000e+00> : vector<24x256xf32>
    %3 = tpu.matmul %2, %1, %cst {dimension_numbers = #tpu.dot_dimension_numbers<[1], [0], [0], [1], [0, 0, 1, 1], [], []>} : vector<24x5xf32>, vector<5x256xf32>, vector<24x256xf32> -> vector<24x256xf32>
    %c0_4 = arith.constant 0 : index
    %c0_5 = arith.constant 0 : index
    %4 = vector.load %arg4[%c0_4, %c0_5] : memref<24x1xf32, #tpu.memory_space<vmem>>, vector<24x1xf32>
    %5 = vector.broadcast %4 : vector<24x1xf32> to vector<24x256xf32>
    %6 = arith.addf %3, %5 : vector<24x256xf32>
    %c256_i32 = arith.constant 256 : i32
    %7 = arith.muli %arg1, %c256_i32 : i32
    %8 = tpu.iota {dimensions = array<i32: 1>} : vector<1x256xi32>
    %9 = vector.broadcast %7 : i32 to vector<1x256xi32>
    %10 = arith.addi %9, %8 : vector<1x256xi32>
    %c15_i32 = arith.constant 15 : i32
    %11 = vector.broadcast %c15_i32 : i32 to vector<1x256xi32>
    %12 = arith.andi %10, %11 : vector<1x256xi32>
    %13 = arith.sitofp %12 : vector<1x256xi32> to vector<1x256xf32>
    %c4_i32 = arith.constant 4 : i32
    %14 = vector.broadcast %c4_i32 : i32 to vector<1x256xi32>
    %15 = arith.shrsi %10, %14 : vector<1x256xi32>
    %16 = arith.sitofp %15 : vector<1x256xi32> to vector<1x256xf32>
    %17 = vector.extract_strided_slice %6 {offsets = [0, 0], sizes = [8, 256], strides = [1, 1]} : vector<24x256xf32> to vector<8x256xf32>
    %18 = vector.extract_strided_slice %6 {offsets = [8, 0], sizes = [8, 256], strides = [1, 1]} : vector<24x256xf32> to vector<8x256xf32>
    %19 = vector.extract_strided_slice %6 {offsets = [16, 0], sizes = [8, 256], strides = [1, 1]} : vector<24x256xf32> to vector<8x256xf32>
    %20 = vector.broadcast %13 : vector<1x256xf32> to vector<8x256xf32>
    %21 = arith.mulf %17, %20 : vector<8x256xf32>
    %22 = vector.broadcast %16 : vector<1x256xf32> to vector<8x256xf32>
    %23 = arith.mulf %18, %22 : vector<8x256xf32>
    %24 = arith.addf %21, %23 : vector<8x256xf32>
    %25 = arith.addf %24, %19 : vector<8x256xf32>
    %26 = math.sin %25 : vector<8x256xf32>
    %c0_6 = arith.constant 0 : index
    %c0_7 = arith.constant 0 : index
    %c0_8 = arith.constant 0 : index
    %27 = vector.load %arg5[%c0_6, %c0_7, %c0_8] : memref<1x8x256xf32, #tpu.memory_space<vmem>>, vector<1x8x256xf32>
    %28 = vector.shape_cast %27 : vector<1x8x256xf32> to vector<8x256xf32>
    %29 = vector.shape_cast %26 : vector<8x256xf32> to vector<1x8x256xf32>
    tpu.vector_store %arg5[%c0_6, %c0_7, %c0_8], %29 {strides = array<i32>} : memref<1x8x256xf32, #tpu.memory_space<vmem>>, vector<1x8x256xf32>,
    return
  }
  func.func @transform_0(%arg0: i32, %arg1: i32) -> (i32, i32, i32) {
    %c0_i32 = arith.constant 0 : i32
    %c0_i32_0 = arith.constant 0 : i32
    return %arg0, %c0_i32, %arg1 : i32, i32, i32
  }
  func.func @transform_1(%arg0: i32, %arg1: i32) -> (i32, i32) {
    %c0_i32 = arith.constant 0 : i32
    %c0_i32_0 = arith.constant 0 : i32
    %c0_i32_1 = arith.constant 0 : i32
    return %c0_i32, %c0_i32_0 : i32, i32
  }
  func.func @transform_2(%arg0: i32, %arg1: i32) -> (i32, i32) {
    %c0_i32 = arith.constant 0 : i32
    %c0_i32_0 = arith.constant 0 : i32
    %c0_i32_1 = arith.constant 0 : i32
    return %c0_i32, %c0_i32_0 : i32, i32
  }
  func.func @transform_3(%arg0: i32, %arg1: i32) -> (i32, i32, i32) {
    %c0_i32 = arith.constant 0 : i32
    %c0_i32_0 = arith.constant 0 : i32
    return %arg0, %c0_i32, %arg1 : i32, i32, i32
  }
}

</mosaic_0001>

<bundles_post_ra>
// kernel: tpu_custom_call.1
= control target key start
LH: loop header
LB: loop body
LE: loop exit
PB: predicated region body
PF: predicated region fallthrough
CT: control target
= control target key end

     0   :  { %8 = vsyncpa [#allocation3], 0  ;;  %s1237_s0 = inlined_call_operand.vmem [shape: f32[2,5,256], index: 0, kind: input, shape index: {}]   ;;  %s1238_s1 = inlined_call_operand.vmem [shape: f32[24,5], index: 1, kind: input, shape index: {}]   ;;  %s1239_s2 = inlined_call_operand.vmem [shape: f32[24,1], index: 2, kind: input, shape index: {}]   ;;  %s1240_s3 = inlined_call_operand.hbm [shape: f32[2,8,256], index: 3, kind: output, shape index: {}]  }
   0x1   :  { %10 = vsyncpa [#allocation3 + $0x1], 0  ;;  %s924_s12 = smov 0   ;;  %s926_s13 = smov 0  }
   0x2   :  { %s928_s14 = smov 0   ;;  %s930_s15 = smov 0  }
   0x3   :  { %s932_s16 = smov 0   ;;  %s934_s17 = smov 0  }
   0x4 LB: > { %s722_s18 = sadd.s32 4294967295, %s895_s17   ;;  %s723_s19 = sadd.s32 4294967294, %s895_s17   ;;  %s895_s17 = sphi %s934_s17, %s16_s17   ;;  %s891_s16 = sphi %s932_s16, %s1251_s16   ;;  %s887_s15 = sphi %s930_s15, %s1250_s15   ;;  %s883_s14 = sphi %s928_s14, %s1249_s14   ;;  %s879_s13 = sphi %s926_s13, %s1248_s13   ;;  %s875_s12 = sphi %s924_s12, %s1247_s12  }
   0x5   : > { %s28_s20 = sadd.s32 1, %s891_s16  ;;  %s107_s21 = sadd.s32 1, %s883_s14 }
   0x6   : > { %p30_p0 = scmp.ge.s32.totalorder %s28_s20, 2  ;;  %p117_p1 = scmp.ne.s32.totalorder %s883_s14, %s879_s13 }
   0x7   : > { %p118_p2 = scmp.eq.s32.totalorder %s722_s18, 1  ;;  %p123_p3 = scmp.ne.s32.totalorder %s879_s13, %s875_s12 }
   0x8   : > { %s1253_s20 = smov (%p30_p0, %s28_s20), 0  ;;  %p124_p5 = scmp.eq.s32.totalorder %s723_s19, 1 }
   0x9   : > { %p964_p4 = por %p118_p2, %p117_p1  ;;  %s102_s23 = ssub.s32 %s891_s16, %s1253_s20 }
   0xa   : > { %p726_p6 = scmp.ge.s32.totalorder %s895_s17, 1  ;;  %p105_p7 = scmp.eq.s32.totalorder %s102_s23, 0 }
   0xb   : > { %p971_p8 = por %p124_p5, %p123_p3  ;;  %p161_p9 = scmp.lt.s32.totalorder %s895_s17, 3 }
   0xc   : > { %s977_s25 = scalar_select %p105_p7, %s883_s14, %s107_s21  }
   0xd   : > { %p162_p10 = pnand %p726_p6, %p161_p9 }
   0xe   : > { %p190_p11 = scmp.lt.s32.totalorder (!%p162_p10), %s887_s15, 1  ;;  %s186_s26 = sand.u32 (!%p162_p10), 1, %s879_s13  }
   0xf   : > { %165 = sbr.rel (%p162_p10) target bundleno = 286 (0x11e), region = 32  ;;  %s727_s27 = sshll.u32 (!%p162_p10), %s186_s26, 4 }
  0x10   : > { %s750_s29 = sshll.u32 (!%p162_p10), %s887_s15, 4  ;;  %s837_s18 = scalar_lea.hbm (!%p162_p10), %s1240_s3, 32 }
  0x11   : > { %s641_s5 = scalar_lea.hbm (!%p162_p10), %s1240_s3, %s750_s29 }
  0x14   : > { %v897_v0 = vmov 0   ;;  %v205_v1 = vld [vmem:[%s1239_s2] sm:$0xff]  ;;  %s191_s28 = scalar_select %p190_p11, %s887_s15, 1  ;;  %v207_v2 = vld [vmem:[%s1239_s2 + $0x10] sm:$0xff]  ;;  %vm233_vm0 = vcmask 1044480   ;;  %v203_v3 = vld [vmem:[%s1238_s1 + $0x8] sm:$0xff]  ;;  %v293_v9 = vlaneseq }
  0x15   : > { %815 = vset.pattern.permute.xlu0 %v897_v0  ;;  %816 = vset.pattern.permute.xlu1 %v897_v0  ;;  %vm223_vm1 = vcmask 39936   ;;  %v202_v6 = vld [vmem:[%s1238_s1] sm:$0xff]  ;;  %v206_v7 = vld [vmem:[%s1239_s2 + $0x8] sm:$0xff]  ;;  %v204_v8 = vld [vmem:[%s1238_s1 + $0x10] sm:$0xff]  ;;  %s628_s15 = scalar_lea.sflag [#allocation3], %s186_s26 }
  0x16   : > { %210 = vperm.xlu0 %815, %v205_v1   ;;  %220 = vperm.xlu1 %816, %v207_v2   ;;  %s749_s4 = sshll.u32 %s191_s28, 4  ;;  %v294_v11 = vand.u32 127, %v293_v9  ;;  %v900_v9 = vmov 2131351028   ;;  %s188_s28 = scalar_lea.vmem [#allocation2], %s727_s27 }
  0x17   : > { %s197_s7 = scalar_lea.vmem %s1237_s0, %s749_s4  ;;  %s643_s6 = sshll.u32 %s188_s28, 4  ;;  %s644_s6 = int_to_ptr.vmem [resolvable:$true] %s643_s6 }
  0x18   : > { %v200_v4 = vld [vmem:[%s197_s7] sm:$0x1f]  ;;  %v201_v5 = vld [vmem:[%s197_s7 + $0x8] sm:$0x1f]  ;;  %v295_v12 = vadd.s32 128, %v294_v11  ;;  %v303_v13 = vshra.s32 %v294_v11, 4 }
  0x19   : > { %751 = vmatpush.msk.msra.mxu2 %vm233_vm0, %v200_v4  ;;  %752 = vmatpush.msk.msra.mxu3 %vm233_vm0, %v201_v5  ;;  %v299_v17 = vand.u32 15, %v294_v11  ;;  %s645_s7 = sshll.u32 %s641_s5, 4  ;;  %s646_s7 = int_to_ptr.hbm [resolvable:$true] %s645_s7 }
  0x1a   : > { %732 = vmatmul.msk.f32.vlgmr.msra.gmra.mxu2 %vm223_vm1, %v203_v3  ;;  %736 = vmatmul.msk.f32.vlgmr.msra.gmra.mxu3 %vm223_vm1, %v203_v3  ;;  %v304_v14 = vshra.s32 %v295_v12, 4  ;;  %v300_v19 = vand.u32 15, %v295_v12  ;;  %v305_v23 = vcvt.s32.f32 %v303_v13  ;;  %v898_v3 = vmov 683565275   ;;  %s831_s8 = sshra.s32 %s646_s7, 4  ;;  %s832_s8 = int_to_ptr.hbm [resolvable:$true] %s831_s8 }
  0x1b   : > { %730 = vmatpush.msk.msra.mxu0 %vm233_vm0, %v200_v4  ;;  %734 = vmatpush.msk.msra.mxu1 %vm233_vm0, %v201_v5  ;;  %v301_v27 = vcvt.s32.f32 %v299_v17  ;;  %v899_v5 = vmov 2475754826   ;;  %v901_v12 = vmov 2102212464   ;;  %s833_s9 = scalar_lea.hbm %s832_s8, 16  ;;  %p838_p1 = scmp.lt.s32.totalorder %s832_s8, %s1240_s3 }
  0x1c   : > { %731 = vmatmul.msk.f32.vlgmr.msra.gmra.mxu0 %vm223_vm1, %v202_v6  ;;  %735 = vmatmul.msk.f32.vlgmr.msra.gmra.mxu1 %vm223_vm1, %v202_v6  ;;  %v306_v25 = vcvt.s32.f32 %v304_v14  ;;  %v302_v29 = vcvt.s32.f32 %v300_v19  ;;  %p834_p12 = scmp.ne.s32.totalorder %s832_s8, %s833_s9  ;;  %p839_p2 = scmp.lt.s32.totalorder %s837_s18, %s833_s9 }
  0x1e   : > { %215 = vperm.xlu0 %815, %v206_v7   ;;  %p835_p13 = pnand %p834_p12, %p964_p4  ;;  %p840_p3 = por %p839_p2, %p838_p1 }
  0x20   : > { %p836_p0 = pneg %p835_p13 }
  0x22   : > { %733 = vmatmul.msk.f32.gmra.mxu2 %vm223_vm1, %v204_v8  ;;  %737 = vmatmul.msk.f32.gmra.mxu3 %vm223_vm1, %v204_v8  ;;  %p841_p5 = pnand %p840_p3, %p836_p0 }
  0x88   : > { %v211_v10 = vpop.permute.xlu0 %210  ;;  %v221_v32 = vpop.permute.xlu1 %220 }
  0x90   : > { %v216_v15 = vpop.permute.xlu0 %215 }
  0x99   : > { %v257_v16 = vpop.f32.mrf.mxu0  ;;  %v283_v18 = vpop.f32.mrf.mxu1 }
  0x9a   : > { %v258_v26 = vadd.f32 %v257_v16, %v211_v10  ;;  %v284_v28 = vadd.f32 %v283_v18, %v211_v10  ;;  %v903_v18 = vmov 1326507024  }
  0x9c   : > { %v307_v33 = vmul.f32 %v301_v27, %v258_v26  ;;  %v308_v34 = vmul.f32 %v302_v29, %v284_v28 }
  0x9d   : > { %v260_v20 = vpop.f32.mrf.mxu2  ;;  %v286_v21 = vpop.f32.mrf.mxu3 }
  0x9e   : > { %v261_v22 = vadd.f32 %v260_v20, %v216_v15  ;;  %v287_v24 = vadd.f32 %v286_v21, %v216_v15  ;;  %v902_v15 = vmov 920167782  }
  0xa0   : > { %v309_v30 = vmul.f32 %v305_v23, %v261_v22  ;;  %v310_v31 = vmul.f32 %v306_v25, %v287_v24 }
  0xa2   : > { %v311_v38 = vadd.f32 %v309_v30, %v307_v33  ;;  %v312_v40 = vadd.f32 %v310_v31, %v308_v34 }
  0xa5   : > { %v263_v35 = vpop.f32.mrf.mxu2  ;;  %v289_v36 = vpop.f32.mrf.mxu3 }
  0xa6   : > { %v264_v37 = vadd.f32 %v263_v35, %v221_v32  ;;  %v290_v39 = vadd.f32 %v289_v36, %v221_v32 }
  0xa8   : > { %v1010_v41 = vadd.f32 %v311_v38, %v264_v37  ;;  %v1012_v42 = vadd.f32 %v312_v40, %v290_v39 }
  0xaa   : > { %v315_v43 = vand.u32 2147483647, %v1010_v41  ;;  %v318_v44 = vand.u32 2139095040, %v1010_v41  ;;  %v470_v45 = vand.u32 2147483647, %v1012_v42  ;;  %v473_v46 = vand.u32 2139095040, %v1012_v42 }
  0xac   : > { %v319_v47 = vshrl.u32 %v318_v44, 23  ;;  %v322_v48 = vand.u32 8388607, %v315_v43  ;;  %v474_v49 = vshrl.u32 %v473_v46, 23  ;;  %v477_v52 = vand.u32 8388607, %v470_v45 }
  0xae   : > { %v738_v50 = vadd.s32 4294967169, %v319_v47  ;;  %v323_v51 = vor.u32 8388608, %v322_v48  ;;  %v741_v53 = vadd.s32 4294967169, %v474_v49  ;;  %v478_v57 = vor.u32 8388608, %v477_v52 }
  0xb0   : > { %v325_v54 = vadd.s32 1, %v738_v50  ;;  %v480_v55 = vadd.s32 1, %v741_v53  ;;  %v1022_v56 = vshll.u32 %v323_v51, 8  ;;  %v1029_v1 = vshll.u32 %v478_v57, 8 }
  0xb2   : > { %vm326_vm2 = vcmp.gt.s32.totalorder %v325_v54, 0  ;;  %vm481_vm3 = vcmp.gt.s32.totalorder %v480_v55, 0  ;;  %v1025_v62 = vand.u32 65535, %v1022_v56  ;;  %v365_v7 = vshrl.u32 %v1022_v56, 16 }
  0xb3   : > { %v327_v58 = vsel %vm326_vm2, %v325_v54, 0  ;;  %v482_v60 = vsel %vm481_vm3, %v480_v55, 0 }
  0xb4   : > { %v329_v59 = vand.u32 31, %v327_v58  ;;  %v1027_v63 = vand.u32 31, %v482_v60  ;;  %v1031_v2 = vshrl.u32 %v327_v58, 5  ;;  %v1069_v50 = vshrl.u32 %v482_v60, 5 }
  0xb6   : > { %v330_v61 = vsub.s32 32, %v329_v59  ;;  %v332_v4 = vshll.u32 %v898_v3, %v329_v59  ;;  %v335_v6 = vshll.u32 %v899_v5, %v329_v59  ;;  %v338_v11 = vshll.u32 %v900_v9, %v329_v59 }
  0xb7   : > { %v341_v14 = vshll.u32 %v901_v12, %v329_v59  ;;  %v344_v17 = vshll.u32 %v902_v15, %v329_v59  ;;  %v1041_v23 = vsub.s32 32, %v1027_v63  ;;  %vm347_vm4 = vcmp.lt.s32.totalorder %v1031_v2, 1 }
  0xb8   : > { %v333_v8 = vshrl.u32 %v899_v5, %v330_v61  ;;  %v336_v10 = vshrl.u32 %v900_v9, %v330_v61  ;;  %v339_v13 = vshrl.u32 %v901_v12, %v330_v61  ;;  %v342_v16 = vshrl.u32 %v902_v15, %v330_v61 }
  0xb9   : > { %v345_v19 = vshrl.u32 %v903_v18, %v330_v61  ;;  %vm348_vm5 = vcmp.lt.s32.totalorder %v1031_v2, 2  ;;  %v331_v26 = vshrl.u32 %v898_v3, %v330_v61  ;;  %vm350_vm6 = vcmp.lt.s32.totalorder %v1031_v2, 4 }
  0xba   : > { %v334_v20 = vor.u32 %v333_v8, %v332_v4  ;;  %v337_v21 = vor.u32 %v336_v10, %v335_v6  ;;  %v340_v22 = vor.u32 %v339_v13, %v338_v11  ;;  %v343_v24 = vor.u32 %v342_v16, %v341_v14 }
  0xbb   : > { %v346_v25 = vor.u32 %v345_v19, %v344_v17  ;;  %vm349_vm7 = vcmp.lt.s32.totalorder %v1031_v2, 3  ;;  %v487_v31 = vshll.u32 %v898_v3, %v1027_v63  ;;  %v488_v35 = vshrl.u32 %v899_v5, %v1041_v23 }
  0xbc   : > { %v355_v27 = vsel %vm347_vm4, %v334_v20, %v337_v21  ;;  %v359_v28 = vsel %vm347_vm4, %v337_v21, %v340_v22  ;;  %v356_v29 = vsel %vm350_vm6, %v343_v24, 920167782  ;;  %v352_v32 = vsel %vm350_vm6, %v340_v22, 2102212464 }
  0xbd   : > { %v360_v30 = vsel %vm350_vm6, %v346_v25, 1326507024  ;;  %v357_v33 = vsel %vm349_vm7, %v340_v22, %v356_v29  ;;  %v490_v38 = vshll.u32 %v899_v5, %v1027_v63  ;;  %v491_v39 = vshrl.u32 %v900_v9, %v1041_v23 }
  0xbe   : > { %v361_v34 = vsel %vm349_vm7, %v343_v24, %v360_v30  ;;  %v358_v36 = vsel %vm348_vm5, %v355_v27, %v357_v33  ;;  %v351_v48 = vsel %vm347_vm4, %v331_v26, %v334_v20  ;;  %v353_v49 = vsel %vm349_vm7, %v337_v21, %v352_v32 }
  0xbf   : > { %v362_v37 = vsel %vm348_vm5, %v359_v28, %v361_v34  ;;  %v388_v46 = vand.u32 65535, %v358_v36  ;;  %v389_v47 = vshrl.u32 %v358_v36, 16  ;;  %v1071_v51 = vor.u32 %v488_v35, %v487_v31 }
  0xc0   : > { %v366_v40 = vand.u32 65535, %v362_v37  ;;  %v367_v44 = vshrl.u32 %v362_v37, 16  ;;  %v1074_v54 = vor.u32 %v491_v39, %v490_v38  ;;  %v494_v55 = vshrl.u32 %v901_v12, %v1041_v23 }
  0xc1   : > { %v391_v58 = vmul.u32 %v389_v47, %v1025_v62  ;;  %v392_v59 = vmul.u32 %v388_v46, %v365_v7  ;;  %v493_v61 = vshll.u32 %v900_v9, %v1027_v63  ;;  %v390_v5 = vmul.u32 %v388_v46, %v1025_v62 }
  0xc2   : > { %v369_v52 = vmul.u32 %v367_v44, %v1025_v62  ;;  %v370_v53 = vmul.u32 %v366_v40, %v365_v7  ;;  %v368_v57 = vmul.u32 %v366_v40, %v1025_v62  ;;  %v371_v4 = vmul.u32 %v367_v44, %v365_v7 }
  0xc3   : > { %v393_v6 = vmul.u32 %v389_v47, %v365_v7  ;;  %v394_v13 = vshll.u32 %v391_v58, 16  ;;  %v396_v16 = vshll.u32 %v392_v59, 16  ;;  %v1082_v17 = vor.u32 %v494_v55, %v493_v61 }
  0xc4   : > { %v372_v60 = vshll.u32 %v369_v52, 16  ;;  %v373_v8 = vshrl.u32 %v369_v52, 16  ;;  %v374_v10 = vshll.u32 %v370_v53, 16  ;;  %v375_v11 = vshrl.u32 %v370_v53, 16 }
  0xc5   : > { %vm398_vm9 = vc.u32 %v390_v5, %v394_v13  ;;  %v400_v20 = vadd.s32 %v394_v13, %v390_v5  ;;  %v497_v9 = vshrl.u32 %v902_v15, %v1041_v23  ;;  %v496_v7 = vshll.u32 %v901_v12, %v1027_v63 }
  0xc6   : > { %vm376_vm8 = vc.u32 %v368_v57, %v372_v60  ;;  %v378_v14 = vadd.s32 %v372_v60, %v368_v57  ;;  %v399_v62 = vsel %vm398_vm9, 1, %v897_v0  ;;  %v499_v25 = vshll.u32 %v902_v15, %v1027_v63 }
  0xc7   : > { %v377_v19 = vsel %vm376_vm8, 1, %v897_v0  ;;  %v401_v24 = vadd.s32 %v399_v62, %v393_v6  ;;  %vm402_vm11 = vc.u32 %v400_v20, %v396_v16  ;;  %v498_v28 = vor.u32 %v497_v9, %v496_v7 }
  0xc8   : > { %v379_v21 = vadd.s32 %v377_v19, %v371_v4  ;;  %vm380_vm10 = vc.u32 %v378_v14, %v374_v10  ;;  %v403_v27 = vsel %vm402_vm11, 1, %v897_v0  ;;  %v500_v29 = vshrl.u32 %v903_v18, %v1041_v23 }
  0xc9   : > { %v381_v22 = vsel %vm380_vm10, 1, %v897_v0  ;;  %v395_v30 = vshrl.u32 %v391_v58, 16  ;;  %v397_v31 = vshrl.u32 %v392_v59, 16  ;;  %v1096_v32 = vadd.s32 %v400_v20, %v396_v16 }
  0xca   : > { %v383_v26 = vadd.s32 %v381_v22, %v379_v21  ;;  %v405_v33 = vadd.s32 %v403_v27, %v401_v24  ;;  %v501_v34 = vor.u32 %v500_v29, %v499_v25  ;;  %vm502_vm12 = vcmp.lt.s32.totalorder %v1069_v50, 1 }
  0xcb   : > { %vm505_vm13 = vcmp.lt.s32.totalorder %v1069_v50, 4  ;;  %vm504_vm14 = vcmp.lt.s32.totalorder %v1069_v50, 3  ;;  %v510_v63 = vsel %vm502_vm12, %v1071_v51, %v1074_v54  ;;  %vm503_vm15 = vcmp.lt.s32.totalorder %v1069_v50, 2 }
  0xcc   : > { %v384_v12 = vadd.s32 %v383_v26, %v373_v8  ;;  %v406_v35 = vadd.s32 %v405_v33, %v395_v30  ;;  %v511_v15 = vsel %vm505_vm13, %v498_v28, 920167782  ;;  %v514_v37 = vsel %vm502_vm12, %v1074_v54, %v1082_v17 }
  0xcd   : > { %v512_v36 = vsel %vm504_vm14, %v1082_v17, %v511_v15  ;;  %v354_v38 = vsel %vm348_vm5, %v351_v48, %v353_v49  ;;  %v515_v44 = vsel %vm505_vm13, %v501_v34, 1326507024  ;;  %v519_v47 = vand.u32 65535, %v1029_v1 }
  0xce   : > { %v1107_v18 = vadd.s32 %v384_v12, %v375_v11  ;;  %v407_v39 = vadd.s32 %v406_v35, %v397_v31  ;;  %v513_v40 = vsel %vm503_vm15, %v510_v63, %v512_v36  ;;  %v516_v46 = vsel %vm504_vm14, %v498_v28, %v515_v44 }
  0xcf   : > { %v543_v52 = vand.u32 65535, %v513_v40  ;;  %v517_v2 = vsel %vm503_vm15, %v514_v37, %v516_v46  ;;  %v520_v48 = vshrl.u32 %v1029_v1, 16  ;;  %v544_v49 = vshrl.u32 %v513_v40, 16 }
  0xd0   : > { %vm410_vm0 = vc.u32 %v1107_v18, %v1096_v32  ;;  %v411_v53 = vadd.s32 1, %v407_v39  ;;  %v408_v55 = vmul.u32 %v1022_v56, %v354_v38  ;;  %v521_v57 = vand.u32 65535, %v517_v2 }
  0xd1   : > { %v522_v58 = vshrl.u32 %v517_v2, 16  ;;  %v546_v61 = vmul.u32 %v544_v49, %v519_v47  ;;  %v547_v4 = vmul.u32 %v543_v52, %v520_v48  ;;  %v486_v8 = vshrl.u32 %v898_v3, %v1041_v23 }
  0xd2   : > { %v412_v59 = vsel %vm410_vm0, %v411_v53, %v407_v39  ;;  %v525_v6 = vmul.u32 %v521_v57, %v520_v48  ;;  %v545_v10 = vmul.u32 %v543_v52, %v519_v47  ;;  %v548_v11 = vmul.u32 %v544_v49, %v520_v48 }
  0xd3   : > { %v413_v60 = vadd.s32 %v412_v59, %v408_v55  ;;  %v524_v5 = vmul.u32 %v522_v58, %v519_v47  ;;  %v549_v13 = vshll.u32 %v546_v61, 16  ;;  %v523_v16 = vmul.u32 %v521_v57, %v519_v47 }
  0xd4   : > { %v526_v19 = vmul.u32 %v522_v58, %v520_v48  ;;  %v529_v9 = vshll.u32 %v525_v6, 16  ;;  %v551_v56 = vshll.u32 %v547_v4, 16  ;;  %v507_v3 = vsel %vm505_vm13, %v1082_v17, 2102212464 }
  0xd5   : > { %v414_v14 = vadd.s32 536870912, %v413_v60  ;;  %v527_v20 = vshll.u32 %v524_v5, 16  ;;  %vm553_vm1 = vc.u32 %v545_v10, %v549_v13  ;;  %v555_v21 = vadd.s32 %v549_v13, %v545_v10 }
  0xd6   : > { %v554_v22 = vsel %vm553_vm1, 1, %v897_v0  ;;  %v506_v28 = vsel %vm502_vm12, %v486_v8, %v1071_v51  ;;  %v550_v30 = vshrl.u32 %v546_v61, 16  ;;  %v508_v17 = vsel %vm504_vm14, %v1074_v54, %v507_v3 }
  0xd7   : > { %v1134_v62 = vshrl.u32 %v414_v14, 30  ;;  %vm531_vm2 = vc.u32 %v523_v16, %v527_v20  ;;  %v533_v7 = vadd.s32 %v527_v20, %v523_v16  ;;  %v556_v24 = vadd.s32 %v554_v22, %v548_v11 }
  0xd8   : > { %v532_v23 = vsel %vm531_vm2, 1, %v897_v0  ;;  %vm557_vm3 = vc.u32 %v555_v21, %v551_v56  ;;  %v528_v12 = vshrl.u32 %v524_v5, 16  ;;  %v552_v35 = vshrl.u32 %v547_v4, 16 }
  0xd9   : > { %v416_v25 = vshll.u32 %v1134_v62, 30  ;;  %v534_v26 = vadd.s32 %v532_v23, %v526_v19  ;;  %vm535_vm4 = vc.u32 %v533_v7, %v529_v9  ;;  %v558_v27 = vsel %vm557_vm3, 1, %v897_v0 }
  0xda   : > { %v536_v29 = vsel %vm535_vm4, 1, %v897_v0  ;;  %v560_v31 = vadd.s32 %v558_v27, %v556_v24  ;;  %v530_v36 = vshrl.u32 %v525_v6, 16  ;;  %v509_v51 = vsel %vm503_vm15, %v506_v28, %v508_v17 }
  0xdb   : > { %v417_v33 = vsub.s32 %v413_v60, %v416_v25  ;;  %v538_v34 = vadd.s32 %v536_v29, %v534_v26  ;;  %v559_v40 = vadd.s32 %v555_v21, %v551_v56  ;;  %v563_v47 = vmul.u32 %v1029_v1, %v509_v51 }
  0xdc   : > { %v561_v63 = vadd.s32 %v560_v31, %v550_v30  ;;  %v409_v49 = vadd.s32 %v1096_v32, %v1107_v18  ;;  %vm317_vm9 = vcmp.lt.s32.totalorder %v1010_v41, 0  ;;  %vm1161_vm10 = vcmp.le.f32.partialorder %v315_v43, 0.7853982 }
  0xdd   : > { %vm418_vm5 = vcmp.lt.s32.totalorder %v417_v33, 0  ;;  %v419_v15 = vsub.s32 0, %v417_v33  ;;  %v539_v37 = vadd.s32 %v538_v34, %v528_v12  ;;  %v439_v21 = vsub.s32 4, %v1134_v62 }
  0xde   : > { %v562_v38 = vadd.s32 %v561_v63, %v552_v35  ;;  %vm472_vm12 = vcmp.lt.s32.totalorder %v1012_v42, 0  ;;  %vm1180_vm13 = vcmp.le.f32.partialorder %v470_v45, 0.7853982  ;;  %vm458_vm1 = vweird.f32 %v1010_v41 }
  0xdf   : > { %v420_v0 = vsel %vm418_vm5, %v419_v15, %v417_v33  ;;  %v540_v39 = vadd.s32 %v539_v37, %v530_v36  ;;  %v440_v28 = vsel %vm317_vm9, %v439_v21, %v1134_v62  ;;  %vm613_vm5 = vweird.f32 %v1012_v42 }
  0xe0   : > { %v421_v44 = vclz %v420_v0  ;;  %v566_v46 = vadd.s32 1, %v562_v38  ;;  %v442_v12 = vsel %vm1161_vm10, 0, %v440_v28 }
  0xe1   : > { %vm565_vm6 = vc.u32 %v540_v39, %v559_v40  ;;  %v564_v22 = vadd.s32 %v559_v40, %v540_v39  ;;  %v459_v51 = vadd.s32 3, %v442_v12 }
  0xe2   : > { %v739_v54 = vadd.s32 4294967294, %v421_v44  ;;  %v567_v52 = vsel %vm565_vm6, %v566_v46, %v562_v38 }
  0xe3   : > { %v568_v53 = vadd.s32 %v567_v52, %v563_v47  ;;  %v460_v46 = vand.u32 3, %v459_v51 }
  0xe4   : > { %vm740_vm7 = vcmp.lt.s32.totalorder %v739_v54, 0 }
  0xe5   : > { %v424_v2 = vsel %vm740_vm7, 0, %v739_v54  ;;  %v569_v48 = vadd.s32 536870912, %v568_v53  ;;  %vm461_vm14 = vcmp.lt.s32.totalorder %v460_v46, 2  ;;  %vm462_vm15 = vcmp.eq.s32.totalorder %v460_v46, 0 }
  0xe6   : > { %v425_v50 = vsub.s32 32, %v424_v2  ;;  %v429_v55 = vsub.s32 4294967266, %v424_v2  ;;  %v426_v58 = vshll.u32 %v417_v33, %v424_v2  ;;  %vm465_vm0 = vcmp.eq.s32.totalorder %v460_v46, 2 }
  0xe7   : > { %v1155_v57 = vshrl.u32 %v569_v48, 30 }
  0xe8   : > { %v427_v59 = vshrl.u32 %v409_v49, %v425_v50  ;;  %v430_v61 = vadd.s32 127, %v429_v55 }
  0xe9   : > { %v571_v4 = vshll.u32 %v1155_v57, 30  ;;  %v594_v48 = vsub.s32 4, %v1155_v57 }
  0xea   : > { %v428_v1 = vor.u32 %v427_v59, %v426_v58  ;;  %v431_v60 = vshll.u32 %v430_v61, 23 }
  0xeb   : > { %v572_v5 = vsub.s32 %v568_v53, %v571_v4  ;;  %v595_v4 = vsel %vm472_vm12, %v594_v48, %v1155_v57 }
  0xec   : > { %v432_v6 = vor.u32 4788187, %v431_v60  ;;  %v435_v11 = vcvt.s32.f32 %v428_v1 }
  0xed   : > { %vm573_vm8 = vcmp.lt.s32.totalorder %v572_v5, 0  ;;  %v574_v8 = vsub.s32 0, %v572_v5 }
  0xee   : > { %v433_v10 = vand.u32 2147483647, %v432_v6  ;;  %v597_v6 = vsel %vm1180_vm13, 0, %v595_v4 }
  0xef   : > { %v575_v13 = vsel %vm573_vm8, %v574_v8, %v572_v5 }
  0xf0   : > { %v436_v14 = vmul.f32 %v435_v11, %v433_v10  ;;  %v576_v32 = vclz %v575_v13 }
  0xf2   : > { %v437_v18 = vxor.u32 2147483648, %v436_v14  ;;  %v742_v16 = vadd.s32 4294967294, %v576_v32 }
  0xf4   : > { %v438_v20 = vsel %vm317_vm9, %v437_v18, %v436_v14  ;;  %vm743_vm11 = vcmp.lt.s32.totalorder %v742_v16, 0  ;;  %v614_v14 = vadd.s32 3, %v597_v6 }
  0xf5   : > { %v441_v9 = vsel %vm1161_vm10, %v1010_v41, %v438_v20  ;;  %v579_v56 = vsel %vm743_vm11, 0, %v742_v16 }
  0xf6   : > { %v443_v7 = vmul.f32 %v441_v9, %v441_v9  ;;  %v580_v3 = vsub.s32 32, %v579_v56  ;;  %v584_v23 = vsub.s32 4294967266, %v579_v56  ;;  %v581_v24 = vshll.u32 %v572_v5, %v579_v56 }
  0xf7   : > { %v615_v19 = vand.u32 3, %v614_v14 }
  0xf8   : > { %v582_v43 = vshrl.u32 %v564_v22, %v580_v3  ;;  %v585_v25 = vadd.s32 127, %v584_v23  ;;  %v444_v26 = vmul.f32 -0.001358992, %v443_v7  ;;  %v451_v27 = vmul.f32 -0.00019511016, %v443_v7 }
  0xf9   : > { %vm617_vm2 = vcmp.eq.s32.totalorder %v615_v19, 0  ;;  %vm620_vm3 = vcmp.eq.s32.totalorder %v615_v19, 2  ;;  %vm616_vm4 = vcmp.lt.s32.totalorder %v615_v19, 2 }
  0xfa   : > { %v583_v29 = vor.u32 %v582_v43, %v581_v24  ;;  %v586_v30 = vshll.u32 %v585_v25, 23  ;;  %v445_v31 = vadd.f32 0.041655596, %v444_v26  ;;  %v452_v33 = vadd.f32 0.008332121, %v451_v27 }
  0xfc   : > { %v587_v17 = vor.u32 4788187, %v586_v30  ;;  %v446_v34 = vmul.f32 %v445_v31, %v443_v7  ;;  %v453_v35 = vmul.f32 %v452_v33, %v443_v7  ;;  %v590_v15 = vcvt.s32.f32 %v583_v29 }
  0xfe   : > { %v588_v63 = vand.u32 2147483647, %v587_v17  ;;  %v447_v36 = vadd.f32 -0.4999988, %v446_v34  ;;  %v454_v37 = vadd.f32 -0.16666654, %v453_v35 }
 0x100   : > { %v591_v38 = vmul.f32 %v590_v15, %v588_v63  ;;  %v448_v0 = vmul.f32 %v447_v36, %v443_v7  ;;  %v455_v62 = vmul.f32 %v454_v37, %v443_v7 }
 0x102   : > { %v592_v39 = vxor.u32 2147483648, %v591_v38  ;;  %v449_v40 = vadd.f32 1.0, %v448_v0  ;;  %v456_v44 = vadd.f32 1.0, %v455_v62 }
 0x104   : > { %v593_v54 = vsel %vm472_vm12, %v592_v39, %v591_v38  ;;  %v457_v52 = vmul.f32 %v456_v44, %v441_v9  ;;  %v466_v53 = vxor.u32 2147483648, %v449_v40 }
 0x105   : > { %v596_v2 = vsel %vm1180_vm13, %v1012_v42, %v593_v54 }
 0x106   : > { %v598_v49 = vmul.f32 %v596_v2, %v596_v2  ;;  %v463_v50 = vxor.u32 2147483648, %v457_v52  ;;  %v467_v55 = vsel %vm465_vm0, %v466_v53, %v457_v52 }
 0x108   : > { %v464_v45 = vsel %vm462_vm15, %v449_v40, %v463_v50  ;;  %v599_v58 = vmul.f32 -0.001358992, %v598_v49  ;;  %v606_v59 = vmul.f32 -0.00019511016, %v598_v49 }
 0x109   : > { %v468_v61 = vsel %vm461_vm14, %v464_v45, %v467_v55 }
 0x10a   : > { %v469_v1 = vsel %vm458_vm1, nan, %v468_v61  ;;  %v600_v60 = vadd.f32 0.041655596, %v599_v58  ;;  %v607_v5 = vadd.f32 0.008332121, %v606_v59 }
 0x10b   : > { %625 = vst [vmem:[%s188_s28] sm:$0xff] %v469_v1 }
 0x10c   : > { %v601_v8 = vmul.f32 %v600_v60, %v598_v49  ;;  %v608_v10 = vmul.f32 %v607_v5, %v598_v49 }
 0x10e   : > { %v602_v11 = vadd.f32 -0.4999988, %v601_v8  ;;  %v609_v13 = vadd.f32 -0.16666654, %v608_v10 }
 0x110   : > { %v603_v41 = vmul.f32 %v602_v11, %v598_v49  ;;  %v610_v32 = vmul.f32 %v609_v13, %v598_v49 }
 0x112   : > { %v604_v18 = vadd.f32 1.0, %v603_v41  ;;  %v611_v16 = vadd.f32 1.0, %v610_v32 }
 0x114   : > { %v612_v57 = vmul.f32 %v611_v16, %v596_v2  ;;  %v621_v20 = vxor.u32 2147483648, %v604_v18 }
 0x116   : > { %v618_v9 = vxor.u32 2147483648, %v612_v57  ;;  %v622_v21 = vsel %vm620_vm3, %v621_v20, %v612_v57 }
 0x118   : > { %v619_v56 = vsel %vm617_vm2, %v604_v18, %v618_v9 }
 0x119   : > { %v623_v7 = vsel %vm616_vm4, %v619_v56, %v622_v21 }
 0x11a   : > { %v624_v22 = vsel %vm613_vm5, nan, %v623_v7 }
 0x11b   : > { %626 = vst [vmem:[%s188_s28 + $0x8] sm:$0xff] %v624_v22 }
 0x11c   : > { %844 = shalt.err (!%p841_p5)
}
 0x11d   : > { %753 = dma.vmem_to_hbm [thread:$0]  (%p964_p4), %s644_s6, 256, %s646_s7, %s628_s15  }
 0x11e PF: > { %p759_p6 = scmp.ge.s32.totalorder %s895_s17, 2  ;;  %s657_s23 = sand.u32 1, %s875_s12  }
 0x11f   : > { %s658_s26 = scalar_lea.sflag [#allocation3], %s657_s23 }
 0x120   : > { %p756_p7 = pnand %p759_p6, %p971_p8 }
 0x122   : > { %p757_p9 = pneg %p756_p7 }
 0x124   : > { %870 = dma.done.wait (%p757_p9), %s658_s26, 256  }
 0x125   : > { %872 = vsyncadd (%p757_p9), %s658_s26, 4294967040  ;;  %s16_s17 = sadd.s32 1, %s895_s17   ;;  %s1247_s12 = smov %s879_s13 }
 0x126   : > { %p13_p10 = scmp.ge.s32.totalorder %s16_s17, 4   ;;  %s1248_s13 = smov %s883_s14 }
 0x127   : > { %s1249_s14 = smov %s977_s25  ;;  %s1250_s15 = smov %s891_s16 }
 0x128   : > { %s1251_s16 = smov %s1253_s20  ;;  %15 = sbr.rel (!%p13_p10) target bundleno = 4 (0x4), region = 67 }
 0x12d   :  { %664 = vsyncpa [#allocation3], 1 }
 0x12e   :  { %666 = vsyncpa [#allocation3 + $0x1], 1 }

</bundles_post_ra>
